<compile_context>
chip_gen: v7x
topology: tpu7x:2x2x1
jax: 0.10.0
libtpu: 0.0.40
codegen_flags: <defaults>
</compile_context>

<pallas_src>
import jax
import jax.numpy as jnp
from jax.experimental import pallas as pl
from jax.experimental.pallas import tpu as pltpu


# ----------------------------------------------------------------------------
# Kernel 1: flattened input projection  pre_gates = X2d @ W_ih^T + bias_sum
# ----------------------------------------------------------------------------
def _input_proj_kernel(x_ref, wih_t_ref, bias_ref, out_ref):
    # x_ref: (tm, I)   wih_t_ref: (I, 4H)   bias_ref: (1, 4H)   out: (tm, 4H)
    acc = jnp.dot(x_ref[...], wih_t_ref[...],
                  preferred_element_type=jnp.float32)
    out_ref[...] = (acc + bias_ref[...]).astype(out_ref.dtype)


# ----------------------------------------------------------------------------
# Kernel 2: the LSTM recurrence over the whole sequence.
#   grid = (batch_blocks "parallel", T/TB "arbitrary")
#   hy_ref / cy_ref ARE the state (VMEM-resident accumulators across t).
# ----------------------------------------------------------------------------
def _lstm_recurrence_kernel(pre_gates_ref, whh_t_ref, hy_ref, cy_ref):
    # pre_gates_ref: (TB, bb, 4H)   whh_t_ref: (H, 4H) resident
    # hy_ref / cy_ref: (bb, H) f32  -- same block for every t -> resident state
    tblk = pl.program_id(1)

    @pl.when(tblk == 0)
    def _():
        hy_ref[...] = jnp.zeros_like(hy_ref)
        cy_ref[...] = jnp.zeros_like(cy_ref)

    TB = pre_gates_ref.shape[0]
    H = hy_ref.shape[-1]
    whh_t = whh_t_ref[...]

    # NOTE: pick H as a multiple of 128 in production so the gate slices below
    # are lane-aligned (unmasked vld/vst, no XLU shuffles).
    def step(i, carry):
        h, c = carry
        # gates = pre_gates[t] + h @ W_hh^T     (f32 accumulation on the MXU)
        # TODO(synk): on v6e/v7x for small H, drive the MXU weight-stationary
        # (pltpu.matmul_push_rhs once per W_hh tile, acc/pop per step).
        gates = pre_gates_ref[i].astype(jnp.float32) + jnp.dot(
            h.astype(whh_t.dtype), whh_t, preferred_element_type=jnp.float32)
        # Gate columns pre-permuted to [ i | f | o | g ]:
        # one contiguous sigmoid over 3H, one tanh over H.
        # TODO(synk): on v5e, if the EUP slot saturates, rewrite sigmoid as
        # 0.5 * (tanh(0.5 * x) + 1) to halve transcendental work.
        sig = jax.nn.sigmoid(gates[:, : 3 * H])
        g = jnp.tanh(gates[:, 3 * H:])
        c_new = sig[:, H:2 * H] * c + sig[:, :H] * g
        h_new = sig[:, 2 * H:3 * H] * jnp.tanh(c_new)
        return h_new, c_new

    # TB timesteps per grid step, fully unrolled so the scheduler can overlap
    # the next step's pre-gate add / EUP work with the current MXU drain.
    h, c = jax.lax.fori_loop(0, TB, step, (hy_ref[...], cy_ref[...]),
                             unroll=True)
    hy_ref[...] = h
    cy_ref[...] = c


# ----------------------------------------------------------------------------
# Small helpers
# ----------------------------------------------------------------------------
def _permute_gate_columns(w):
    """Reorder the trailing 4H axis from PyTorch's [i|f|g|o] to [i|f|o|g]."""
    i, f, g, o = jnp.split(w, 4, axis=-1)
    return jnp.concatenate([i, f, o, g], axis=-1)


def _pick_batch_block(batch, cap):
    """Largest 8-aligned divisor of `batch` <= cap, preferring >=2 blocks so
    both TensorCores get work on megacore parts (v7x)."""
    cands = [bb for bb in range(8, min(cap, batch) + 1, 8) if batch % bb == 0]
    if not cands:
        return batch                       # tiny / unaligned batch: one block
    multi = [bb for bb in cands if batch // bb >= 2]
    return max(multi) if multi else max(cands)


def _pick_time_block(T):
    for tb in (8, 4, 2):
        if T % tb == 0:
            return tb
    return 1


def _vmem_limit_bytes():
    # ~100 MiB on v5e/v6e (128 MiB physical), ~56 MiB on v7x (64 MiB physical).
    try:
        cap = pltpu.get_tpu_info().vmem_capacity_bytes
    except Exception:
        cap = 64 * 1024 * 1024
    return int(min(cap - 8 * 1024 * 1024, 100 * 1024 * 1024))


def _resident_spec(block_shape, index_map, single_buffer):
    """BlockSpec for an operand whose block never changes (constant index_map).
    Single-buffering it avoids a wasted second VMEM copy of the weights."""
    if single_buffer:
        return pl.BlockSpec(block_shape, index_map,
                            pipeline_mode=pl.Buffered(1))
    return pl.BlockSpec(block_shape, index_map)


# ----------------------------------------------------------------------------
# Wrapper: LSTMLayer forward.
# ----------------------------------------------------------------------------
def lstm_layer(x, weight_ih, weight_hh, bias_ih, bias_hh, *,
               param_dtype=jnp.float32, pre_gates_dtype=None,
               batch_block_cap=256, single_buffer_weights=True):
    """x: [T, B, I]; returns (hy, cy) after the last timestep (zero init state).

    The PyTorch LSTMLayer returns only hy; cy is returned too for checking.
      param_dtype=bf16      -> both matmuls run in bf16 on the MXU (gate/state
                               math stays f32).
      pre_gates_dtype       -> dtype of the pre_gates HBM stream (defaults to
                               param_dtype; bf16 halves kernel 2's dominant
                               HBM traffic).
      batch_block_cap       -> 256 default; prefer 128 on v5e.
    """
    T, B, I = x.shape
    H = weight_hh.shape[1]
    assert weight_ih.shape == (4 * H, I)
    assert weight_hh.shape == (4 * H, H)
    assert bias_ih.shape == (4 * H,) and bias_hh.shape == (4 * H,)
    if pre_gates_dtype is None:
        pre_gates_dtype = param_dtype

    # glue: transpose weights, fold both biases once, permute gate columns.
    wih_t = _permute_gate_columns(weight_ih.T).astype(param_dtype)   # [I, 4H]
    whh_t = _permute_gate_columns(weight_hh.T).astype(param_dtype)   # [H, 4H]
    bias = _permute_gate_columns(
        (bias_ih + bias_hh).reshape(1, 4 * H)).astype(jnp.float32)   # [1, 4H]

    vmem_limit = _vmem_limit_bytes()

    # ---- kernel 1: pre_gates = (T*B, I) @ (I, 4H) + bias --------------------
    M = T * B
    tm = min(512, M)                     # row tile: multiple of 8, or == M
    x2d = x.reshape(M, I).astype(param_dtype)

    pre_gates = pl.pallas_call(
        _input_proj_kernel,
        out_shape=jax.ShapeDtypeStruct((M, 4 * H), pre_gates_dtype),
        grid_spec=pltpu.PrefetchScalarGridSpec(
            num_scalar_prefetch=0,
            grid=(pl.cdiv(M, tm),),
            in_specs=[
                pl.BlockSpec((tm, I), lambda m: (m, 0)),
                _resident_spec((I, 4 * H), lambda m: (0, 0),
                               single_buffer_weights),
                _resident_spec((1, 4 * H), lambda m: (0, 0),
                               single_buffer_weights),
            ],
            out_specs=pl.BlockSpec((tm, 4 * H), lambda m: (m, 0)),
        ),
        compiler_params=pltpu.CompilerParams(
            dimension_semantics=("parallel",),
            vmem_limit_bytes=vmem_limit),
    )(x2d, wih_t, bias)
    pre_gates = pre_gates.reshape(T, B, 4 * H)

    # ---- kernel 2: the recurrence, whole sequence in one pallas_call --------
    bb = _pick_batch_block(B, batch_block_cap)
    TB = _pick_time_block(T)

    # TODO(synk): for very large H on v7x (64 MiB VMEM/TC), add a third grid
    # axis over 4H slabs of W_hh^T (index_map (0, n)), accumulate gate slabs
    # into a (bb, 4H) scratch and gate the state update on the last slab
    # (keeping t outer to the slab axis).
    hy, cy = pl.pallas_call(
        _lstm_recurrence_kernel,
        out_shape=(
            jax.ShapeDtypeStruct((B, H), jnp.float32),
            jax.ShapeDtypeStruct((B, H), jnp.float32),
        ),
        grid_spec=pltpu.PrefetchScalarGridSpec(
            num_scalar_prefetch=0,
            grid=(B // bb, T // TB),
            in_specs=[
                pl.BlockSpec((TB, bb, 4 * H), lambda b, t: (t, b, 0)),
                _resident_spec((H, 4 * H), lambda b, t: (0, 0),
                               single_buffer_weights),
            ],
            out_specs=(
                pl.BlockSpec((bb, H), lambda b, t: (b, 0)),
                pl.BlockSpec((bb, H), lambda b, t: (b, 0)),
            ),
        ),
        compiler_params=pltpu.CompilerParams(
            dimension_semantics=("parallel", "arbitrary"),
            vmem_limit_bytes=vmem_limit),
    )(pre_gates, whh_t)

    return hy, cy


# ----------------------------------------------------------------------------
# Pure-JAX reference (matches the PyTorch LSTMCell / LSTMLayer semantics).
# ----------------------------------------------------------------------------
def lstm_layer_ref(x, weight_ih, weight_hh, bias_ih, bias_hh):
    T, B, _ = x.shape
    H = weight_hh.shape[1]
    h0 = jnp.zeros((B, H), jnp.float32)
    c0 = jnp.zeros((B, H), jnp.float32)

    def step(carry, x_t):
        h, c = carry
        gates = x_t @ weight_ih.T + bias_ih + h @ weight_hh.T + bias_hh
        i, f, g, o = jnp.split(gates, 4, axis=1)
        i = jax.nn.sigmoid(i)
        f = jax.nn.sigmoid(f)
        g = jnp.tanh(g)
        o = jax.nn.sigmoid(o)
        c = f * c + i * g
        h = o * jnp.tanh(c)
        return (h, c), None

    (h, c), _ = jax.lax.scan(step, (h0, c0), x)
    return h, c


if __name__ == "__main__":
    T, B, INPUT, HIDDEN = 8, 8, 16, 32

    key = jax.random.PRNGKey(0)
    k = jax.random.split(key, 5)
    x = jax.random.normal(k[0], (T, B, INPUT), dtype=jnp.float32)
    weight_ih = jax.random.normal(k[1], (4 * HIDDEN, INPUT), dtype=jnp.float32)
    weight_hh = jax.random.normal(k[2], (4 * HIDDEN, HIDDEN), dtype=jnp.float32)
    bias_ih = jax.random.normal(k[3], (4 * HIDDEN,), dtype=jnp.float32)
    bias_hh = jax.random.normal(k[4], (4 * HIDDEN,), dtype=jnp.float32)

    args = (x, weight_ih, weight_hh, bias_ih, bias_hh)

    # f32 path: strict correctness check.
    try:
        hy, cy = jax.block_until_ready(lstm_layer(*args))
    except Exception:
        # Fallback if this JAX build rejects single-buffered resident weights.
        hy, cy = jax.block_until_ready(
            lstm_layer(*args, single_buffer_weights=False))

    hy_ref, cy_ref = lstm_layer_ref(*args)
    assert jnp.allclose(hy, hy_ref, atol=1e-3, rtol=1e-3), (
        float(jnp.max(jnp.abs(hy - hy_ref))))
    assert jnp.allclose(cy, cy_ref, atol=1e-3, rtol=1e-3), (
        float(jnp.max(jnp.abs(cy - cy_ref))))

    # bf16 MXU operands + bf16 pre_gates stream (recommended production
    # config); loose tolerance — sanity check of the low-precision path only.
    try:
        hy_bf, _ = jax.block_until_ready(
            lstm_layer(*args, param_dtype=jnp.bfloat16))
    except Exception:
        hy_bf, _ = jax.block_until_ready(
            lstm_layer(*args, param_dtype=jnp.bfloat16,
                       single_buffer_weights=False))
    assert jnp.allclose(hy_bf.astype(jnp.float32), hy_ref, atol=0.15, rtol=0.1), (
        float(jnp.max(jnp.abs(hy_bf.astype(jnp.float32) - hy_ref))))

    print("KERNEL_OK")
</pallas_src>

<mosaic_0001>
module attributes {stable_mosaic.version = 11 : i64} {
  func.func @_input_proj_kernel(%arg0: i32, %arg1: memref<64x16xf32, #tpu.memory_space<vmem>>, %arg2: memref<16x128xf32, #tpu.memory_space<vmem>>, %arg3: memref<1x128xf32, #tpu.memory_space<vmem>>, %arg4: memref<64x128xf32, #tpu.memory_space<vmem>>) attributes {dimension_semantics = [#tpu.dimension_semantics<parallel>], iteration_bounds = array<i64: 1>, scalar_prefetch = 0 : i64, scratch_operands = 0 : i64, tpu.core_type = #tpu.core_type<tc>, window_params = [{transform_indices = @transform_0, window_bounds = array<i64: 64, 16>}, {pipeline_mode = #tpu.pipeline_mode<synchronous>, transform_indices = @transform_1, window_bounds = array<i64: 16, 128>}, {pipeline_mode = #tpu.pipeline_mode<synchronous>, transform_indices = @transform_2, window_bounds = array<i64: 1, 128>}, {transform_indices = @transform_3, window_bounds = array<i64: 64, 128>}]} {
    %c0 = arith.constant 0 : index
    %c0_0 = arith.constant 0 : index
    %0 = vector.load %arg1[%c0, %c0_0] : memref<64x16xf32, #tpu.memory_space<vmem>>, vector<64x16xf32>
    %c0_1 = arith.constant 0 : index
    %c0_2 = arith.constant 0 : index
    %1 = vector.load %arg2[%c0_1, %c0_2] : memref<16x128xf32, #tpu.memory_space<vmem>>, vector<16x128xf32>
    %cst = arith.constant dense<0.000000e+00> : vector<64x128xf32>
    %2 = tpu.matmul %0, %1, %cst {dimension_numbers = #tpu.dot_dimension_numbers<[1], [0], [0], [1], [0, 0, 1, 1], [], []>} : vector<64x16xf32>, vector<16x128xf32>, vector<64x128xf32> -> vector<64x128xf32>
    %c0_3 = arith.constant 0 : index
    %c0_4 = arith.constant 0 : index
    %3 = vector.load %arg3[%c0_3, %c0_4] : memref<1x128xf32, #tpu.memory_space<vmem>>, vector<1x128xf32>
    %4 = vector.broadcast %3 : vector<1x128xf32> to vector<64x128xf32>
    %5 = arith.addf %2, %4 : vector<64x128xf32>
    %c0_5 = arith.constant 0 : index
    %c0_6 = arith.constant 0 : index
    %6 = vector.load %arg4[%c0_5, %c0_6] : memref<64x128xf32, #tpu.memory_space<vmem>>, vector<64x128xf32>
    tpu.vector_store %arg4[%c0_5, %c0_6], %5 {strides = array<i32>} : memref<64x128xf32, #tpu.memory_space<vmem>>, vector<64x128xf32>,
    return
  }
  func.func @transform_0(%arg0: i32) -> (i32, i32) {
    %c0_i32 = arith.constant 0 : i32
    %c0_i32_0 = arith.constant 0 : i32
    return %arg0, %c0_i32 : i32, i32
  }
  func.func @transform_1(%arg0: i32) -> (i32, i32) {
    %c0_i32 = arith.constant 0 : i32
    %c0_i32_0 = arith.constant 0 : i32
    %c0_i32_1 = arith.constant 0 : i32
    return %c0_i32, %c0_i32_0 : i32, i32
  }
  func.func @transform_2(%arg0: i32) -> (i32, i32) {
    %c0_i32 = arith.constant 0 : i32
    %c0_i32_0 = arith.constant 0 : i32
    %c0_i32_1 = arith.constant 0 : i32
    return %c0_i32, %c0_i32_0 : i32, i32
  }
  func.func @transform_3(%arg0: i32) -> (i32, i32) {
    %c0_i32 = arith.constant 0 : i32
    %c0_i32_0 = arith.constant 0 : i32
    return %arg0, %c0_i32 : i32, i32
  }
}

module attributes {stable_mosaic.version = 11 : i64} {
  func.func @_input_proj_kernel(%arg0: i32, %arg1: memref<64x16xf32, #tpu.memory_space<vmem>>, %arg2: memref<16x128xf32, #tpu.memory_space<vmem>>, %arg3: memref<1x128xf32, #tpu.memory_space<vmem>>, %arg4: memref<64x128xf32, #tpu.memory_space<vmem>>) attributes {dimension_semantics = [#tpu.dimension_semantics<parallel>], iteration_bounds = array<i64: 1>, scalar_prefetch = 0 : i64, scratch_operands = 0 : i64, tpu.core_type = #tpu.core_type<tc>, window_params = [{transform_indices = @transform_0, window_bounds = array<i64: 64, 16>}, {pipeline_mode = #tpu.pipeline_mode<synchronous>, transform_indices = @transform_1, window_bounds = array<i64: 16, 128>}, {pipeline_mode = #tpu.pipeline_mode<synchronous>, transform_indices = @transform_2, window_bounds = array<i64: 1, 128>}, {transform_indices = @transform_3, window_bounds = array<i64: 64, 128>}]} {
    %c0 = arith.constant 0 : index
    %c0_0 = arith.constant 0 : index
    %0 = vector.load %arg1[%c0, %c0_0] : memref<64x16xf32, #tpu.memory_space<vmem>>, vector<64x16xf32>
    %c0_1 = arith.constant 0 : index
    %c0_2 = arith.constant 0 : index
    %1 = vector.load %arg2[%c0_1, %c0_2] : memref<16x128xf32, #tpu.memory_space<vmem>>, vector<16x128xf32>
    %cst = arith.constant dense<0.000000e+00> : vector<64x128xf32>
    %2 = tpu.matmul %0, %1, %cst {dimension_numbers = #tpu.dot_dimension_numbers<[1], [0], [0], [1], [0, 0, 1, 1], [], []>} : vector<64x16xf32>, vector<16x128xf32>, vector<64x128xf32> -> vector<64x128xf32>
    %c0_3 = arith.constant 0 : index
    %c0_4 = arith.constant 0 : index
    %3 = vector.load %arg3[%c0_3, %c0_4] : memref<1x128xf32, #tpu.memory_space<vmem>>, vector<1x128xf32>
    %4 = vector.broadcast %3 : vector<1x128xf32> to vector<64x128xf32>
    %5 = arith.addf %2, %4 : vector<64x128xf32>
    %c0_5 = arith.constant 0 : index
    %c0_6 = arith.constant 0 : index
    %6 = vector.load %arg4[%c0_5, %c0_6] : memref<64x128xf32, #tpu.memory_space<vmem>>, vector<64x128xf32>
    tpu.vector_store %arg4[%c0_5, %c0_6], %5 {strides = array<i32>} : memref<64x128xf32, #tpu.memory_space<vmem>>, vector<64x128xf32>,
    return
  }
  func.func @transform_0(%arg0: i32) -> (i32, i32) {
    %c0_i32 = arith.constant 0 : i32
    %c0_i32_0 = arith.constant 0 : i32
    return %arg0, %c0_i32 : i32, i32
  }
  func.func @transform_1(%arg0: i32) -> (i32, i32) {
    %c0_i32 = arith.constant 0 : i32
    %c0_i32_0 = arith.constant 0 : i32
    %c0_i32_1 = arith.constant 0 : i32
    return %c0_i32, %c0_i32_0 : i32, i32
  }
  func.func @transform_2(%arg0: i32) -> (i32, i32) {
    %c0_i32 = arith.constant 0 : i32
    %c0_i32_0 = arith.constant 0 : i32
    %c0_i32_1 = arith.constant 0 : i32
    return %c0_i32, %c0_i32_0 : i32, i32
  }
  func.func @transform_3(%arg0: i32) -> (i32, i32) {
    %c0_i32 = arith.constant 0 : i32
    %c0_i32_0 = arith.constant 0 : i32
    return %arg0, %c0_i32 : i32, i32
  }
}

</mosaic_0001>

<bundles_post_ra>
// kernel: tpu_custom_call.1
= control target key start
LH: loop header
LB: loop body
LE: loop exit
PB: predicated region body
PF: predicated region fallthrough
CT: control target
= control target key end

     0   :  { %vm32_vm0 = vcmask 130048   ;;  %s330_s0 = inlined_call_operand.vmem [shape: f32[64,16], index: 0, kind: input, shape index: {}]   ;;  %s331_s1 = inlined_call_operand.vmem [shape: f32[16,128], index: 1, kind: input, shape index: {}]   ;;  %s332_s2 = inlined_call_operand.vmem [shape: f32[1,128], index: 2, kind: input, shape index: {}]   ;;  %s333_s3 = inlined_call_operand.hbm [shape: f32[64,128], index: 3, kind: output, shape index: {}]  }
   0x1   :  { %v23_v0 = vld [vmem:[%s331_s1] sm:$0xff]  ;;  %v24_v1 = vld [vmem:[%s331_s1 + $0x8] sm:$0xff] }
   0x2   :  { %v15_v2 = vld [vmem:[%s330_s0] sm:$0xff]  ;;  %v221_v3 = vpack.c.bf16 %v24_v1, %v23_v0 }
   0x3   :  { %209 = vmatprep.mubr.msk.f32.mxu0 %vm32_vm0, %v15_v2  ;;  %v19_v4 = vld [vmem:[%s330_s0 + $0x20] sm:$0xff] }
   0x4   :  { %215 = vmatprep.mubr.msk.f32.mxu1 %vm32_vm0, %v19_v4  ;;  %222 = vmatprep.subr.bf16.mxu0 %v221_v3 }
   0x5   :  { %225 = vmatprep.subr.bf16.mxu1 %v221_v3 }
   0x6   :  { %8 = vsyncpa [#allocation3], 0  ;;  %224 = vmatpush3.bf16.msra.mxu0 %v221_v3  ;;  %226 = vmatpush3.bf16.msra.mxu1 %v221_v3  ;;  %v16_v5 = vld [vmem:[%s330_s0 + $0x8] sm:$0xff]  ;;  %v17_v7 = vld [vmem:[%s330_s0 + $0x10] sm:$0xff]  ;;  %s254_s6 = smov [#allocation2]  }
   0x7   :  { %v20_v6 = vld [vmem:[%s330_s0 + $0x28] sm:$0xff]  ;;  %v21_v8 = vld [vmem:[%s330_s0 + $0x30] sm:$0xff]  ;;  %v18_v9 = vld [vmem:[%s330_s0 + $0x18] sm:$0xff]  ;;  %s175_s7 = sshll.u32 %s254_s6, 4  ;;  %s176_s7 = int_to_ptr.vmem [resolvable:$true] %s175_s7 }
   0x8   :  { %v22_v10 = vld [vmem:[%s330_s0 + $0x38] sm:$0xff]  ;;  %v186_v11 = vld [vmem:[%s332_s2] ss:$0 sm:$0xff]  ;;  %s230_s0 = scalar_lea.vmem %s176_s7, 1024  ;;  %p235_p1 = scmp.lt.s32.totalorder %s176_s7, %s176_s7 }
   0x9   :  { %210 = vmatmul.mubr.msk.f32.vlgmr.msra.gmra.mrb[0].mxu0 %vm32_vm0, %v16_v5  ;;  %216 = vmatmul.mubr.msk.f32.vlgmr.msra.gmra.mrb[0].mxu1 %vm32_vm0, %v20_v6  ;;  %p231_p0 = scmp.ne.s32.totalorder %s176_s7, %s230_s0  ;;  %p236_p2 = scmp.lt.s32.totalorder %s230_s0, %s230_s0 }
   0xa   :  { %212 = vmatprep.mubr.msk.f32.mxu0 %vm32_vm0, %v17_v7  ;;  %218 = vmatprep.mubr.msk.f32.mxu1 %vm32_vm0, %v21_v8 }
   0xb   :  { %p237_p3 = por %p236_p2, %p235_p1 }
   0xd   :  { %213 = vmatmul.mubr.msk.f32.gmra.mrb[2].mxu0 %vm32_vm0, %v18_v9  ;;  %219 = vmatmul.mubr.msk.f32.gmra.mrb[2].mxu1 %vm32_vm0, %v22_v10  ;;  %p238_p4 = pnand %p237_p3, %p231_p0 }
  0xdc   :  { %v211_v12 = vpop.f32.mrb[0].mxu0  ;;  %v217_v13 = vpop.f32.mrb[0].mxu1 }
  0xdd   :  { %v129_v14 = vadd.f32 %v211_v12, %v186_v11  ;;  %v149_v15 = vadd.f32 %v217_v13, %v186_v11  ;;  %v123_v16 = vpop.f32.mrb[1].mxu0  ;;  %v143_v17 = vpop.f32.mrb[1].mxu1 }
  0xde   :  { %v124_v18 = vadd.f32 %v186_v11, %v123_v16  ;;  %v144_v19 = vadd.f32 %v186_v11, %v143_v17 }
  0xdf   :  { %163 = vst [vmem:[#allocation2 + $0x8] sm:$0xff] %v129_v14  ;;  %167 = vst [vmem:[#allocation2 + $0x28] sm:$0xff] %v149_v15 }
  0xe0   :  { %162 = vst [vmem:[#allocation2] sm:$0xff] %v124_v18  ;;  %166 = vst [vmem:[#allocation2 + $0x20] sm:$0xff] %v144_v19  ;;  %v214_v20 = vpop.f32.mrb[2].mxu0  ;;  %v220_v21 = vpop.f32.mrb[2].mxu1 }
  0xe1   :  { %v139_v22 = vadd.f32 %v214_v20, %v186_v11  ;;  %v159_v23 = vadd.f32 %v220_v21, %v186_v11  ;;  %v133_v24 = vpop.f32.mrb[3].mxu0  ;;  %v153_v25 = vpop.f32.mrb[3].mxu1 }
  0xe2   :  { %v134_v26 = vadd.f32 %v186_v11, %v133_v24  ;;  %v154_v27 = vadd.f32 %v186_v11, %v153_v25 }
  0xe3   :  { %165 = vst [vmem:[#allocation2 + $0x18] sm:$0xff] %v139_v22  ;;  %169 = vst [vmem:[#allocation2 + $0x38] sm:$0xff] %v159_v23 }
  0xe4   :  { %164 = vst [vmem:[#allocation2 + $0x10] sm:$0xff] %v134_v26  ;;  %168 = vst [vmem:[#allocation2 + $0x30] sm:$0xff] %v154_v27 }
  0xe5   :  { %241 = shalt.err (!%p238_p4)
}
  0xe6   :  { %s242_s9 = scalar_lea.hbm %s333_s3, 1024 }
  0xe7   :  { %p243_p5 = scmp.ne.s32.totalorder %s333_s3, %s242_s9  ;;  %p246_p6 = scmp.lt.u32.totalorder %s242_s9, %s333_s3 }
  0xe9   :  { %p248_p7 = pnand %p246_p6, %p243_p5 }
  0xeb   :  { %251 = shalt.err (!%p248_p7)
}
  0xec   :  { %s255_s14 = smov 128   ;;  %s256_s15 = smov 8  }
  0xed   :  { %181 = dma.vmem_to_hbm [thread:$0]  %s176_s7, 1024, %s333_s3, [#allocation3], %s255_s14, %s255_s14, %s256_s15  }
  0xee   :  { %252 = dma.done.wait [#allocation3], 1024  }
  0xef   :  { %253 = vsyncadd [#allocation3], 4294966272 }
  0xf0   :  { %185 = vsyncpa [#allocation3], 1 }

// kernel: tpu_custom_call.1
= control target key start
LH: loop header
LB: loop body
LE: loop exit
PB: predicated region body
PF: predicated region fallthrough
CT: control target
= control target key end

     0   :  { %vm32_vm0 = vcmask 130048   ;;  %s330_s0 = inlined_call_operand.vmem [shape: f32[64,16], index: 0, kind: input, shape index: {}]   ;;  %s331_s1 = inlined_call_operand.vmem [shape: f32[16,128], index: 1, kind: input, shape index: {}]   ;;  %s332_s2 = inlined_call_operand.vmem [shape: f32[1,128], index: 2, kind: input, shape index: {}]   ;;  %s333_s3 = inlined_call_operand.hbm [shape: f32[64,128], index: 3, kind: output, shape index: {}]  }
   0x1   :  { %v23_v0 = vld [vmem:[%s331_s1] sm:$0xff]  ;;  %v24_v1 = vld [vmem:[%s331_s1 + $0x8] sm:$0xff] }
   0x2   :  { %v15_v2 = vld [vmem:[%s330_s0] sm:$0xff]  ;;  %v221_v3 = vpack.c.bf16 %v24_v1, %v23_v0 }
   0x3   :  { %209 = vmatprep.mubr.msk.f32.mxu0 %vm32_vm0, %v15_v2  ;;  %v19_v4 = vld [vmem:[%s330_s0 + $0x20] sm:$0xff] }
   0x4   :  { %215 = vmatprep.mubr.msk.f32.mxu1 %vm32_vm0, %v19_v4  ;;  %222 = vmatprep.subr.bf16.mxu0 %v221_v3 }
   0x5   :  { %225 = vmatprep.subr.bf16.mxu1 %v221_v3 }
   0x6   :  { %8 = vsyncpa [#allocation3], 0  ;;  %224 = vmatpush3.bf16.msra.mxu0 %v221_v3  ;;  %226 = vmatpush3.bf16.msra.mxu1 %v221_v3  ;;  %v16_v5 = vld [vmem:[%s330_s0 + $0x8] sm:$0xff]  ;;  %v17_v7 = vld [vmem:[%s330_s0 + $0x10] sm:$0xff]  ;;  %s254_s6 = smov [#allocation2]  }
   0x7   :  { %v20_v6 = vld [vmem:[%s330_s0 + $0x28] sm:$0xff]  ;;  %v21_v8 = vld [vmem:[%s330_s0 + $0x30] sm:$0xff]  ;;  %v18_v9 = vld [vmem:[%s330_s0 + $0x18] sm:$0xff]  ;;  %s175_s7 = sshll.u32 %s254_s6, 4  ;;  %s176_s7 = int_to_ptr.vmem [resolvable:$true] %s175_s7 }
   0x8   :  { %v22_v10 = vld [vmem:[%s330_s0 + $0x38] sm:$0xff]  ;;  %v186_v11 = vld [vmem:[%s332_s2] ss:$0 sm:$0xff]  ;;  %s230_s0 = scalar_lea.vmem %s176_s7, 1024  ;;  %p235_p1 = scmp.lt.s32.totalorder %s176_s7, %s176_s7 }
   0x9   :  { %210 = vmatmul.mubr.msk.f32.vlgmr.msra.gmra.mrb[0].mxu0 %vm32_vm0, %v16_v5  ;;  %216 = vmatmul.mubr.msk.f32.vlgmr.msra.gmra.mrb[0].mxu1 %vm32_vm0, %v20_v6  ;;  %p231_p0 = scmp.ne.s32.totalorder %s176_s7, %s230_s0  ;;  %p236_p2 = scmp.lt.s32.totalorder %s230_s0, %s230_s0 }
   0xa   :  { %212 = vmatprep.mubr.msk.f32.mxu0 %vm32_vm0, %v17_v7  ;;  %218 = vmatprep.mubr.msk.f32.mxu1 %vm32_vm0, %v21_v8 }
   0xb   :  { %p237_p3 = por %p236_p2, %p235_p1 }
   0xd   :  { %213 = vmatmul.mubr.msk.f32.gmra.mrb[2].mxu0 %vm32_vm0, %v18_v9  ;;  %219 = vmatmul.mubr.msk.f32.gmra.mrb[2].mxu1 %vm32_vm0, %v22_v10  ;;  %p238_p4 = pnand %p237_p3, %p231_p0 }
  0xdc   :  { %v211_v12 = vpop.f32.mrb[0].mxu0  ;;  %v217_v13 = vpop.f32.mrb[0].mxu1 }
  0xdd   :  { %v129_v14 = vadd.f32 %v211_v12, %v186_v11  ;;  %v149_v15 = vadd.f32 %v217_v13, %v186_v11  ;;  %v123_v16 = vpop.f32.mrb[1].mxu0  ;;  %v143_v17 = vpop.f32.mrb[1].mxu1 }
  0xde   :  { %v124_v18 = vadd.f32 %v186_v11, %v123_v16  ;;  %v144_v19 = vadd.f32 %v186_v11, %v143_v17 }
  0xdf   :  { %163 = vst [vmem:[#allocation2 + $0x8] sm:$0xff] %v129_v14  ;;  %167 = vst [vmem:[#allocation2 + $0x28] sm:$0xff] %v149_v15 }
  0xe0   :  { %162 = vst [vmem:[#allocation2] sm:$0xff] %v124_v18  ;;  %166 = vst [vmem:[#allocation2 + $0x20] sm:$0xff] %v144_v19  ;;  %v214_v20 = vpop.f32.mrb[2].mxu0  ;;  %v220_v21 = vpop.f32.mrb[2].mxu1 }
  0xe1   :  { %v139_v22 = vadd.f32 %v214_v20, %v186_v11  ;;  %v159_v23 = vadd.f32 %v220_v21, %v186_v11  ;;  %v133_v24 = vpop.f32.mrb[3].mxu0  ;;  %v153_v25 = vpop.f32.mrb[3].mxu1 }
  0xe2   :  { %v134_v26 = vadd.f32 %v186_v11, %v133_v24  ;;  %v154_v27 = vadd.f32 %v186_v11, %v153_v25 }
  0xe3   :  { %165 = vst [vmem:[#allocation2 + $0x18] sm:$0xff] %v139_v22  ;;  %169 = vst [vmem:[#allocation2 + $0x38] sm:$0xff] %v159_v23 }
  0xe4   :  { %164 = vst [vmem:[#allocation2 + $0x10] sm:$0xff] %v134_v26  ;;  %168 = vst [vmem:[#allocation2 + $0x30] sm:$0xff] %v154_v27 }
  0xe5   :  { %241 = shalt.err (!%p238_p4)
}
  0xe6   :  { %s242_s9 = scalar_lea.hbm %s333_s3, 1024 }
  0xe7   :  { %p243_p5 = scmp.ne.s32.totalorder %s333_s3, %s242_s9  ;;  %p246_p6 = scmp.lt.u32.totalorder %s242_s9, %s333_s3 }
  0xe9   :  { %p248_p7 = pnand %p246_p6, %p243_p5 }
  0xeb   :  { %251 = shalt.err (!%p248_p7)
}
  0xec   :  { %s255_s14 = smov 128   ;;  %s256_s15 = smov 8  }
  0xed   :  { %181 = dma.vmem_to_hbm [thread:$0]  %s176_s7, 1024, %s333_s3, [#allocation3], %s255_s14, %s255_s14, %s256_s15  }
  0xee   :  { %252 = dma.done.wait [#allocation3], 1024  }
  0xef   :  { %253 = vsyncadd [#allocation3], 4294966272 }
  0xf0   :  { %185 = vsyncpa [#allocation3], 1 }

</bundles_post_ra>
